<compile_context>
chip_gen: v5e
topology: v5e:2x2
jax: 0.10.0
libtpu: 0.0.40
codegen_flags: <defaults>
</compile_context>

<pallas_src>
import jax
import jax.numpy as jnp
from jax.experimental import pallas as pl
from jax.experimental.pallas import tpu as pltpu


def _graph_linear_kernel(w_ref, b_ref, x_ref, o_ref):
    # w_ref: (C_out, C_in)   b_ref: (C_out, 1)     [resident across steps]
    # x_ref: (TB, C_in, TV)  o_ref: (TB, C_out, TV) [native-layout tiles]
    w = w_ref[...]
    bias = b_ref[...]                       # (C_out, 1) broadcasts over lanes
    for i in range(x_ref.shape[0]):         # TB is small & static: unrolled
        y = jnp.dot(w, x_ref[i], preferred_element_type=jnp.float32)
        o_ref[i] = (y + bias).astype(o_ref.dtype)


def graph_linear(x, W, b, *, tv_cap=8192, tb_cap=8,
                 target_step_bytes=4 * 1024 * 1024):
    """x: (B, C_in, V), W: (C_out, C_in), b: (C_out,) -> (B, C_out, V)."""
    B, C_in, V = x.shape
    C_out = W.shape[0]
    itemsize = jnp.dtype(x.dtype).itemsize

    # Lane tile over V: full dim if tiny, else a multiple of 128 (the ragged
    # last block, if any, is handled by Pallas with masked stores).
    if V <= 128:
        TV = V
    else:
        TV = max(128, (min(tv_cap, V) // 128) * 128)
    nv = pl.cdiv(V, TV)

    # Batch rows per step: enough that x+y traffic per step beats the fixed
    # per-step overhead, capped so the in-kernel unroll stays small.
    bytes_per_row = (C_in + C_out) * TV * itemsize
    TB = max(1, min(B, tb_cap, target_step_bytes // max(1, bytes_per_row)))
    # Keep at least 2 grid steps when possible (v7x megacore + DMA overlap).
    if pl.cdiv(B, TB) * nv < 2 and B >= 2:
        TB = pl.cdiv(B, 2)
    nb = pl.cdiv(B, TB)

    b2d = b.reshape(C_out, 1).astype(jnp.float32)   # bias add stays in f32

    # VMEM budget from the real footprint: double-buffered x/out tiles plus
    # the (tiny) resident W and bias, with ~1 MiB slack.
    x_tile = TB * C_in * TV * itemsize
    o_tile = TB * C_out * TV * itemsize
    const_bytes = (C_out * C_in + C_out) * itemsize
    vmem_limit = int(min(max(2 * (x_tile + o_tile) + 4 * const_bytes
                             + (1 << 20), 4 << 20), 40 << 20))

    cost = pl.CostEstimate(
        flops=2 * C_out * C_in * B * V,
        transcendentals=0,
        bytes_accessed=(B * C_in * V + B * C_out * V + C_out * C_in + C_out)
        * itemsize,
    )

    return pl.pallas_call(
        _graph_linear_kernel,
        out_shape=jax.ShapeDtypeStruct((B, C_out, V), x.dtype),
        grid_spec=pltpu.PrefetchScalarGridSpec(
            num_scalar_prefetch=0,
            grid=(nb, nv),
            in_specs=[
                # Constant index_maps -> W/bias stay resident, no re-DMA.
                pl.BlockSpec((C_out, C_in), lambda i, j: (0, 0)),      # W
                pl.BlockSpec((C_out, 1), lambda i, j: (0, 0)),         # bias
                pl.BlockSpec((TB, C_in, TV), lambda i, j: (i, 0, j)),  # x tile
            ],
            out_specs=pl.BlockSpec((TB, C_out, TV), lambda i, j: (i, 0, j)),
        ),
        compiler_params=pltpu.CompilerParams(
            dimension_semantics=("parallel", "parallel"),
            vmem_limit_bytes=vmem_limit,
        ),
        cost_estimate=cost,
    )(W, b2d, x)


if __name__ == "__main__":
    # Shapes implied by the module: x (B, in_channels, num_vertices)
    B, C_in, C_out, V = 2, 32, 16, 128

    key = jax.random.PRNGKey(0)
    kx, kw, kb = jax.random.split(key, 3)

    # Deterministic parameter init mirroring reset_parameters():
    # uniform(-w_stdv, w_stdv) with w_stdv = 1 / (in_channels * out_channels)
    w_stdv = 1.0 / (C_in * C_out)
    W = jax.random.uniform(kw, (C_out, C_in), jnp.float32, -w_stdv, w_stdv)
    b = jax.random.uniform(kb, (C_out,), jnp.float32, -w_stdv, w_stdv)
    x = jax.random.normal(kx, (B, C_in, V), jnp.float32)

    y = graph_linear(x, W, b)
    y = jax.block_until_ready(y)

    # Reference check in plain JAX (same math as the PyTorch forward).
    y_ref = jnp.einsum("oi,biv->bov", W, x) + b[None, :, None]
    assert y.shape == (B, C_out, V)
    assert jnp.allclose(y, y_ref, atol=1e-5, rtol=1e-5)

    print("KERNEL_OK")
</pallas_src>

<mosaic_0001>
module attributes {stable_mosaic.version = 11 : i64} {
  func.func @_graph_linear_kernel(%arg0: i32, %arg1: i32, %arg2: memref<16x32xf32, #tpu.memory_space<vmem>>, %arg3: memref<16x1xf32, #tpu.memory_space<vmem>>, %arg4: memref<1x32x128xf32, #tpu.memory_space<vmem>>, %arg5: memref<1x16x128xf32, #tpu.memory_space<vmem>>) attributes {dimension_semantics = [#tpu.dimension_semantics<parallel>, #tpu.dimension_semantics<parallel>], iteration_bounds = array<i64: 2, 1>, scalar_prefetch = 0 : i64, scratch_operands = 0 : i64, tpu.core_type = #tpu.core_type<tc>, window_params = [{pipeline_mode = #tpu.pipeline_mode<synchronous>, transform_indices = @transform_0, window_bounds = array<i64: 16, 32>}, {pipeline_mode = #tpu.pipeline_mode<synchronous>, transform_indices = @transform_1, window_bounds = array<i64: 16, 1>}, {transform_indices = @transform_2, window_bounds = array<i64: 1, 32, 128>}, {transform_indices = @transform_3, window_bounds = array<i64: 1, 16, 128>}]} {
    %c0 = arith.constant 0 : index
    %c0_0 = arith.constant 0 : index
    %0 = vector.load %arg2[%c0, %c0_0] : memref<16x32xf32, #tpu.memory_space<vmem>>, vector<16x32xf32>
    %c0_1 = arith.constant 0 : index
    %c0_2 = arith.constant 0 : index
    %1 = vector.load %arg3[%c0_1, %c0_2] : memref<16x1xf32, #tpu.memory_space<vmem>>, vector<16x1xf32>
    %c0_3 = arith.constant 0 : index
    %c0_4 = arith.constant 0 : index
    %c0_5 = arith.constant 0 : index
    %2 = vector.load %arg4[%c0_3, %c0_4, %c0_5] : memref<1x32x128xf32, #tpu.memory_space<vmem>>, vector<1x32x128xf32>
    %3 = vector.shape_cast %2 : vector<1x32x128xf32> to vector<32x128xf32>
    %cst = arith.constant dense<0.000000e+00> : vector<16x128xf32>
    %4 = tpu.matmul %0, %3, %cst {dimension_numbers = #tpu.dot_dimension_numbers<[1], [0], [0], [1], [0, 0, 1, 1], [], []>} : vector<16x32xf32>, vector<32x128xf32>, vector<16x128xf32> -> vector<16x128xf32>
    %5 = vector.broadcast %1 : vector<16x1xf32> to vector<16x128xf32>
    %6 = arith.addf %4, %5 : vector<16x128xf32>
    %c0_6 = arith.constant 0 : index
    %c0_7 = arith.constant 0 : index
    %c0_8 = arith.constant 0 : index
    %7 = vector.load %arg5[%c0_6, %c0_7, %c0_8] : memref<1x16x128xf32, #tpu.memory_space<vmem>>, vector<1x16x128xf32>
    %8 = vector.shape_cast %7 : vector<1x16x128xf32> to vector<16x128xf32>
    %9 = vector.shape_cast %6 : vector<16x128xf32> to vector<1x16x128xf32>
    tpu.vector_store %arg5[%c0_6, %c0_7, %c0_8], %9 {strides = array<i32>} : memref<1x16x128xf32, #tpu.memory_space<vmem>>, vector<1x16x128xf32>,
    return
  }
  func.func @transform_0(%arg0: i32, %arg1: i32) -> (i32, i32) {
    %c0_i32 = arith.constant 0 : i32
    %c0_i32_0 = arith.constant 0 : i32
    %c0_i32_1 = arith.constant 0 : i32
    return %c0_i32, %c0_i32_0 : i32, i32
  }
  func.func @transform_1(%arg0: i32, %arg1: i32) -> (i32, i32) {
    %c0_i32 = arith.constant 0 : i32
    %c0_i32_0 = arith.constant 0 : i32
    %c0_i32_1 = arith.constant 0 : i32
    return %c0_i32, %c0_i32_0 : i32, i32
  }
  func.func @transform_2(%arg0: i32, %arg1: i32) -> (i32, i32, i32) {
    %c0_i32 = arith.constant 0 : i32
    %c0_i32_0 = arith.constant 0 : i32
    return %arg0, %c0_i32, %arg1 : i32, i32, i32
  }
  func.func @transform_3(%arg0: i32, %arg1: i32) -> (i32, i32, i32) {
    %c0_i32 = arith.constant 0 : i32
    %c0_i32_0 = arith.constant 0 : i32
    return %arg0, %c0_i32, %arg1 : i32, i32, i32
  }
}

</mosaic_0001>

<bundles_post_ra>
// kernel: tpu_custom_call.1
= control target key start
LH: loop header
LB: loop body
LE: loop exit
PB: predicated region body
PF: predicated region fallthrough
CT: control target
= control target key end

     0   :  { %8 = vsyncpa [#allocation3], 0  ;;  %s723_s0 = inlined_call_operand.vmem [shape: f32[16,32], index: 0, kind: input, shape index: {}]   ;;  %s724_s1 = inlined_call_operand.vmem [shape: f32[16,1], index: 1, kind: input, shape index: {}]   ;;  %s725_s2 = inlined_call_operand.hbm [shape: f32[2,32,128], index: 2, kind: input, shape index: {}]   ;;  %s726_s3 = inlined_call_operand.hbm [shape: f32[2,16,128], index: 3, kind: output, shape index: {}]  }
   0x1   :  { %10 = vsyncpa [#allocation3 + $0x1], 0 }
   0x2   :  { %11 = vsyncpa [#allocation4], 0 }
   0x3   :  { %13 = vsyncpa [#allocation4 + $0x1], 0  ;;  %s590_s12 = smov 0   ;;  %s592_s13 = smov 0  }
   0x4   :  { %s594_s14 = smov 0   ;;  %s596_s15 = smov 0  }
   0x5   :  { %s598_s16 = smov 0   ;;  %s600_s17 = smov 0  }
   0x6 LB: > { %s360_s18 = sadd.s32 4294967295, %s563_s17   ;;  %s361_s19 = sadd.s32 4294967294, %s563_s17   ;;  %s563_s17 = sphi %s600_s17, %s19_s17   ;;  %s559_s16 = sphi %s598_s16, %s735_s16   ;;  %s555_s15 = sphi %s596_s15, %s734_s15   ;;  %s551_s14 = sphi %s594_s14, %s733_s14   ;;  %s547_s13 = sphi %s592_s13, %s732_s13   ;;  %s543_s12 = sphi %s590_s12, %s731_s12  }
   0x7   : > { %s31_s20 = sadd.s32 1, %s559_s16  ;;  %s82_s21 = sadd.s32 1, %s551_s14 }
   0x8   : > { %p33_p0 = scmp.ge.s32.totalorder %s31_s20, 2  ;;  %p89_p1 = scmp.ne.s32.totalorder %s551_s14, %s547_s13 }
   0x9   : > { %p90_p2 = scmp.eq.s32.totalorder %s563_s17, 0  ;;  %p95_p3 = scmp.ne.s32.totalorder %s547_s13, %s543_s12 }
   0xa   : > { %s737_s20 = smov (%p33_p0, %s31_s20), 0  ;;  %p96_p5 = scmp.eq.s32.totalorder %s360_s18, 0 }
   0xb   : > { %p631_p4 = por %p90_p2, %p89_p1  ;;  %s77_s23 = ssub.s32 %s559_s16, %s737_s20 }
   0xc   : > { %p121_p6 = scmp.eq.s32.totalorder %s360_s18, 1  ;;  %p80_p7 = scmp.eq.s32.totalorder %s77_s23, 0 }
   0xd   : > { %p637_p8 = por %p96_p5, %p95_p3  ;;  %p127_p10 = scmp.eq.s32.totalorder %s361_s19, 1 }
   0xe   : > { %p641_p9 = por %p121_p6, %p89_p1  ;;  %p363_p12 = scmp.ge.s32.totalorder %s563_s17, 2 }
   0xf   : > { %s646_s26 = scalar_select %p80_p7, %s551_s14, %s82_s21  }
  0x10   : > { %p648_p11 = por %p127_p10, %p95_p3  ;;  %p395_p13 = scmp.lt.s32.totalorder %s563_s17, 2 }
  0x11   : > { %s153_s28 = sand.u32 1, %s551_s14   ;;  %s377_s30 = sshll.u32 %s559_s16, 5 }
  0x12   : > { %s364_s29 = sshll.u32 %s153_s28, 5  ;;  %s163_s6 = scalar_lea.hbm %s725_s2, %s377_s30 }
  0x13   : > { %s157_s7 = scalar_lea.vmem [#allocation2], %s364_s29  ;;  %s164_s9 = sshll.u32 %s163_s6, 4  ;;  %s165_s9 = int_to_ptr.hbm [resolvable:$true] %s164_s9 }
  0x14   : > { %s166_s8 = sshll.u32 %s157_s7, 4  ;;  %p388_p0 = pnand %p395_p13, %p631_p4  ;;  %s167_s8 = int_to_ptr.vmem [resolvable:$true] %s166_s8 }
  0x15   : > { %p367_p1 = scmp.ge.s32.totalorder %s563_s17, 1  ;;  %s154_s10 = scalar_lea.sflag [#allocation3], %s153_s28 }
  0x16   : > { %s565_s11 = smov 128   ;;  %s566_s18 = smov 8  }
  0x17   : > { %390 = dma.hbm_to_vmem [thread:$0]  (!%p388_p0), %s165_s9, 512, %s167_s8, %s154_s10, %s565_s11, %s565_s11, %s566_s18  }
  0x18   : > { %p174_p2 = scmp.lt.s32.totalorder %s563_s17, 3 }
  0x1a   : > { %p175_p3 = pnand %p367_p1, %p174_p2 }
  0x1b   : > { %s664_s19 = sand.u32 (!%p175_p3), 1, %s547_s13  }
  0x1c   : > { %178 = sbr.rel (%p175_p3) target bundleno = 175 (0xaf), region = 32  ;;  %s368_s21 = sshll.u32 (!%p175_p3), %s664_s19, 5 }
  0x1d   : > { %s181_s23 = scalar_lea.sflag (!%p175_p3), [#allocation3], %s664_s19  ;;  %s184_s29 = scalar_lea.vmem (!%p175_p3), [#allocation2], %s368_s21 }
  0x21   : > { %534 = dma.done.wait (%p637_p8), %s181_s23, 512  }
  0x22   : > { %536 = vsyncadd (%p637_p8), %s181_s23, 4294966784  ;;  %v567_v0 = vmov 0   ;;  %v215_v1 = vld [vmem:[%s184_s29 + $0x18] sm:$0xff]  ;;  %v214_v2 = vld [vmem:[%s184_s29 + $0x10] sm:$0xff]  ;;  %vm226_vm0 = vcmask 261120   ;;  %s369_s8 = sshll.u32 %s664_s19, 4 }
  0x23   : > { %450 = vset.pattern.permute.xlu0 %v567_v0  ;;  %v210_v3 = vld [vmem:[%s724_s1] sm:$0xff]  ;;  %245 = vmatpush.msra.mxu0 %v215_v1  ;;  %v213_v4 = vld [vmem:[%s184_s29 + $0x8] sm:$0xff]  ;;  %s378_s9 = sshll.u32 %s555_s15, 4  ;;  %s207_s21 = scalar_lea.vmem [#allocation5], %s369_s8 }
  0x24   : > { %379 = vmatpush.msra.mxu1 %v215_v1  ;;  %218 = vperm.xlu0 %450, %v210_v3   ;;  %v212_v5 = vld [vmem:[%s184_s29] sm:$0xff]  ;;  %v209_v7 = vld [vmem:[%s723_s0 + $0x8] sm:$0xff]  ;;  %s271_s18 = scalar_lea.hbm %s726_s3, %s378_s9  ;;  %s272_s23 = sshll.u32 %s207_s21, 4  ;;  %s273_s23 = int_to_ptr.vmem [resolvable:$true] %s272_s23 }
  0x25   : > { %246 = vmatpush.msra.mxu0 %v214_v2  ;;  %v208_v6 = vld [vmem:[%s723_s0] sm:$0xff]  ;;  %v211_v8 = vld [vmem:[%s724_s1 + $0x8] sm:$0xff]  ;;  %s274_s29 = sshll.u32 %s271_s18, 4  ;;  %s259_s22 = scalar_lea.sflag [#allocation4], %s664_s19  ;;  %s275_s29 = int_to_ptr.hbm [resolvable:$true] %s274_s29 }
  0x26   : > { %380 = vmatpush.msra.mxu1 %v214_v2  ;;  %s495_s28 = sshra.s32 %s275_s29, 4  ;;  %s501_s4 = scalar_lea.hbm %s726_s3, 32  ;;  %s496_s28 = int_to_ptr.hbm [resolvable:$true] %s495_s28 }
  0x27   : > { %247 = vmatpush.msra.mxu0 %v213_v4  ;;  %s497_s15 = scalar_lea.hbm %s496_s28, 16  ;;  %p502_p7 = scmp.lt.s32.totalorder %s496_s28, %s726_s3 }
  0x28   : > { %381 = vmatpush.msra.mxu1 %v213_v4  ;;  %p498_p4 = scmp.ne.s32.totalorder %s496_s28, %s497_s15  ;;  %p503_p8 = scmp.lt.s32.totalorder %s501_s4, %s497_s15 }
  0x29   : > { %248 = vmatpush.msra.mxu0 %v212_v5 }
  0x2a   : > { %382 = vmatpush.msra.mxu1 %v212_v5  ;;  %370 = vmatmul.msk.f32.vlgmr.msra.gmra.mxu0 %vm226_vm0, %v208_v6  ;;  %p499_p5 = pnand %p498_p4, %p641_p9  ;;  %p504_p10 = por %p503_p8, %p502_p7 }
  0x2b   : > { %371 = vmatmul.msk.f32.vlgmr.msra.gmra.mxu1 %vm226_vm0, %v209_v7 }
  0x2c   : > { %223 = vperm.xlu0 %450, %v211_v8   ;;  %p500_p6 = pneg %p499_p5 }
  0x2e   : > { %p505_p13 = pnand %p504_p10, %p500_p6 }
  0x96   : > { %v219_v9 = vpop.permute.xlu0 %218 }
  0x9e   : > { %v224_v10 = vpop.permute.xlu0 %223 }
  0xa7   : > { %v250_v11 = vpop.f32.mrf.mxu0 }
  0xa8   : > { %v253_v12 = vpop.f32.mrf.mxu1  ;;  %v251_v13 = vadd.f32 %v250_v11, %v219_v9 }
  0xa9   : > { %v254_v14 = vadd.f32 %v253_v12, %v224_v10 }
  0xaa   : > { %256 = vst [vmem:[%s207_s21] sm:$0xff] %v251_v13 }
  0xab   : > { %257 = vst [vmem:[%s207_s21 + $0x8] sm:$0xff] %v254_v14 }
  0xac   : > { %508 = shalt.err (!%p505_p13)
}
  0xad   : > { %s568_s19 = smov 128   ;;  %s569_s7 = smov 8  }
  0xae   : > { %385 = dma.vmem_to_hbm [thread:$0]  (%p641_p9), %s273_s23, 256, %s275_s29, %s259_s22, %s568_s19, %s568_s19, %s569_s7  }
  0xaf PF: > { %s289_s8 = sand.u32 1, %s543_s12   ;;  %p392_p0 = pnand %p363_p12, %p648_p11 }
  0xb0   : > { %s290_s9 = scalar_lea.sflag [#allocation4], %s289_s8 }
  0xb1   : > { %p393_p1 = pneg %p392_p0 }
  0xb3   : > { %538 = dma.done.wait (%p393_p1), %s290_s9, 256  }
  0xb4   : > { %540 = vsyncadd (%p393_p1), %s290_s9, 4294967040  ;;  %s19_s17 = sadd.s32 1, %s563_s17   ;;  %s731_s12 = smov %s547_s13 }
  0xb5   : > { %p16_p2 = scmp.ge.s32.totalorder %s19_s17, 4   ;;  %s732_s13 = smov %s551_s14 }
  0xb6   : > { %s733_s14 = smov %s646_s26  ;;  %s734_s15 = smov %s559_s16 }
  0xb7   : > { %s735_s16 = smov %s737_s20  ;;  %18 = sbr.rel (!%p16_p2) target bundleno = 6 (0x6), region = 77 }
  0xbc   :  { %296 = vsyncpa [#allocation3], 1 }
  0xbd   :  { %298 = vsyncpa [#allocation3 + $0x1], 1 }
  0xbe   :  { %299 = vsyncpa [#allocation4], 1 }
  0xbf   :  { %301 = vsyncpa [#allocation4 + $0x1], 1 }

</bundles_post_ra>
